<compile_context>
chip_gen: v7x
topology: tpu7x:2x2x1
jax: 0.10.0
libtpu: 0.0.40
codegen_flags: <defaults>
</compile_context>

<pallas_src>
import functools

import jax
import jax.numpy as jnp
from jax.experimental import pallas as pl
from jax.experimental.pallas import tpu as pltpu


def _round_up(x: int, m: int) -> int:
    return ((x + m - 1) // m) * m


def decoder_y_kernel(z_ref, w1_ref, b1_ref, w2_ref, b2_ref, w3_ref, b3_ref, o_ref):
    # z streams as f32 from HBM; cast to bf16 in-register (free VPU filler under DMA).
    zb = z_ref[...].astype(jnp.bfloat16)

    # --- fc1: bf16 MXU dot, f32 accumulation; bias + ReLU in f32 ---
    h1 = jnp.dot(zb, w1_ref[...], preferred_element_type=jnp.float32)
    h1 = jnp.maximum(h1 + b1_ref[...], 0.0)

    # --- fc2 ---
    h2 = jnp.dot(h1.astype(jnp.bfloat16), w2_ref[...], preferred_element_type=jnp.float32)
    h2 = jnp.maximum(h2 + b2_ref[...], 0.0)

    # --- fc3: class axis padded to a 128-lane multiple; padded bias cols are -1e30
    #          (f32) so padded classes get exactly-0 probability after softmax ---
    logits = jnp.dot(h2.astype(jnp.bfloat16), w3_ref[...], preferred_element_type=jnp.float32)
    logits = logits + b3_ref[...]

    # --- numerically stable softmax along the last (lane) dim, all in f32 ---
    m = jnp.max(logits, axis=-1, keepdims=True)
    e = jnp.exp(logits - m)
    s = jnp.sum(e, axis=-1, keepdims=True)
    r = pl.reciprocal(s, approx=True)     # EUP slot (otherwise idle here)
    r = r * (2.0 - s * r)                 # one Newton step -> near-exact
    probs = e * r                         # [batch_tile, n_class_lanes] f32

    # --- lane-dense-in-batch output: transpose (XLU slot) and keep only the first
    #     round_up(n_class, 8) rows -> [n_class_rows, batch_tile] f32 store ---
    probs_t = jnp.transpose(probs)
    n_rows = o_ref.shape[0]
    o_ref[...] = probs_t[:n_rows, :].astype(o_ref.dtype)


def prepare_params(params):
    """One-time parameter prep: bf16 weights, f32 biases, class axis padded to 128 lanes.

    Returns (prepped_dict, n_class). Call once outside the per-step jit path.
    Note: b3 padding uses -1e30 and is kept in f32 (so it does not become -inf).
    """
    n_class = params["w3"].shape[1]
    n_class_lanes = _round_up(n_class, 128)
    pad_c = n_class_lanes - n_class
    w3_pad = jnp.pad(params["w3"], ((0, 0), (0, pad_c)))                          # zero weights
    b3_pad = jnp.pad(params["b3"], ((0, 0), (0, pad_c)), constant_values=-1e30)   # ~ -inf bias
    prepped = {
        "w1": params["w1"].astype(jnp.bfloat16),
        "b1": params["b1"].astype(jnp.float32),
        "w2": params["w2"].astype(jnp.bfloat16),
        "b2": params["b2"].astype(jnp.float32),
        "w3": w3_pad.astype(jnp.bfloat16),
        "b3": b3_pad.astype(jnp.float32),
    }
    return prepped, n_class


@functools.partial(jax.jit, static_argnames=("n_class", "batch_tile", "vmem_limit_bytes"))
def decoder_y(z, prepped, *, n_class, batch_tile: int = 2048, vmem_limit_bytes=None):
    """DecoderY forward: softmax(fc3(relu(fc2(relu(fc1(z)))))) as one Pallas kernel.

    z: [B, dim_in] float32.  prepped: output of prepare_params().  Returns [B, n_class] f32.
    """
    B, dim_in = z.shape
    hidden = prepped["w1"].shape[1]
    n_class_lanes = prepped["w3"].shape[1]          # multiple of 128
    n_class_rows = _round_up(n_class, 8)            # rows of the transposed output

    # ---- batch tiling ----
    if B <= 256:
        # single tile (block == full array, so no 128-lane requirement on the output block)
        batch_tile_eff = _round_up(max(B, 1), 16)
    else:
        # multiple of 128 (lane-dense transposed output block), >= 2 grid steps so the
        # "parallel" batch axis shards across v7x's two TensorCores, and small enough
        # that the double-buffered f32 z tile stays within ~12 MiB per buffer.
        cap_half = _round_up((B + 1) // 2, 128)
        cap_vmem = max(128, (((12 << 20) // max(dim_in * 4, 1)) // 128) * 128)
        batch_tile_eff = max(128, min(_round_up(int(batch_tile), 128), cap_half, cap_vmem))
    B_pad = _round_up(B, batch_tile_eff)
    if B_pad != B:
        z = jnp.pad(z, ((0, B_pad - B), (0, 0)))
    grid = (B_pad // batch_tile_eff,)

    # ---- VMEM budget derived from actual block sizes (safe on v7x's 64 MiB) ----
    if vmem_limit_bytes is None:
        est = (
            2 * batch_tile_eff * dim_in * 4                                   # z double buffer (f32)
            + batch_tile_eff * dim_in * 2                                     # in-kernel bf16 copy of z
            + 2 * (dim_in * hidden + hidden * hidden + hidden * n_class_lanes) * 2  # bf16 weights (dbl-buf)
            + 4 * (hidden + n_class_lanes) * 4                                # biases (tiny)
            + batch_tile_eff * (2 * hidden + 3 * n_class_lanes) * 4           # f32 temporaries
            + 2 * n_class_rows * batch_tile_eff * 4                           # out double buffer
        )
        vmem_limit_bytes = int(min(max(int(1.5 * est) + (4 << 20), 32 << 20), 64 << 20))

    # Weights/biases are small: keep them VMEM-resident (block index fixed at 0).
    in_specs = [
        pl.BlockSpec((batch_tile_eff, dim_in), lambda i: (i, 0)),    # z tile (streamed, f32)
        pl.BlockSpec((dim_in, hidden), lambda i: (0, 0)),            # w1 (bf16)
        pl.BlockSpec((1, hidden), lambda i: (0, 0)),                 # b1 (f32)
        pl.BlockSpec((hidden, hidden), lambda i: (0, 0)),            # w2 (bf16)
        pl.BlockSpec((1, hidden), lambda i: (0, 0)),                 # b2 (f32)
        pl.BlockSpec((hidden, n_class_lanes), lambda i: (0, 0)),     # w3 (bf16, padded)
        pl.BlockSpec((1, n_class_lanes), lambda i: (0, 0)),          # b3 (f32, padded)
    ]
    # Transposed output: [n_class_rows, B_pad], lane-dense in batch.
    out_spec = pl.BlockSpec((n_class_rows, batch_tile_eff), lambda i: (0, i))

    out_t = pl.pallas_call(
        decoder_y_kernel,
        out_shape=jax.ShapeDtypeStruct((n_class_rows, B_pad), jnp.float32),
        grid_spec=pltpu.PrefetchScalarGridSpec(
            num_scalar_prefetch=0,
            grid=grid,
            in_specs=in_specs,
            out_specs=out_spec,
        ),
        compiler_params=pltpu.CompilerParams(
            dimension_semantics=("parallel",),
            vmem_limit_bytes=vmem_limit_bytes,
        ),
    )(z, prepped["w1"], prepped["b1"], prepped["w2"], prepped["b2"],
      prepped["w3"], prepped["b3"])

    # tiny wrapper-side transpose + slice back to [B, n_class]
    return out_t[:n_class, :B].T


def init_params(key, dim_in, n_class=2, hidden=64):
    """Deterministic synthetic parameter init (matches nn.Linear shapes)."""
    k1, k2, k3, k4, k5, k6 = jax.random.split(key, 6)

    def lin(kw, kb, fan_in, fan_out):
        bound = 1.0 / jnp.sqrt(fan_in)
        w = jax.random.uniform(kw, (fan_in, fan_out), jnp.float32, -bound, bound)
        b = jax.random.uniform(kb, (1, fan_out), jnp.float32, -bound, bound)
        return w, b

    w1, b1 = lin(k1, k2, dim_in, hidden)
    w2, b2 = lin(k3, k4, hidden, hidden)
    w3, b3 = lin(k5, k6, hidden, n_class)
    return {"w1": w1, "b1": b1, "w2": w2, "b2": b2, "w3": w3, "b3": b3}


def decoder_y_ref(z, p, compute_dtype=jnp.bfloat16):
    """Pure-JAX reference with the same bf16-compute / f32-accumulate scheme."""
    c = lambda x: x.astype(compute_dtype).astype(jnp.float32)
    h1 = jnp.maximum(c(z) @ c(p["w1"]) + p["b1"], 0.0)
    h2 = jnp.maximum(c(h1) @ c(p["w2"]) + p["b2"], 0.0)
    logits = c(h2) @ c(p["w3"]) + p["b3"]
    return jax.nn.softmax(logits, axis=-1)


def decoder_y_ref_f32(z, p):
    h1 = jnp.maximum(z @ p["w1"] + p["b1"], 0.0)
    h2 = jnp.maximum(h1 @ p["w2"] + p["b2"], 0.0)
    return jax.nn.softmax(h2 @ p["w3"] + p["b3"], axis=-1)


if __name__ == "__main__":
    key = jax.random.PRNGKey(0)
    kz, kp = jax.random.split(key)

    B, dim_in, n_class = 8, 32, 2
    z = jax.random.normal(kz, (B, dim_in), dtype=jnp.float32)
    params = init_params(kp, dim_in, n_class)

    prepped, n_cls = prepare_params(params)        # one-time prep (hoisted out of per-call path)
    out = decoder_y(z, prepped, n_class=n_cls)
    out = jax.block_until_ready(out)
    assert out.shape == (B, n_class)

    # Match the bf16-compute reference tightly ...
    ref = decoder_y_ref(z, params)
    assert jnp.allclose(out, ref, atol=1e-4, rtol=1e-4), float(jnp.max(jnp.abs(out - ref)))
    # ... and the full-f32 reference loosely (bf16 input/weight rounding only).
    ref32 = decoder_y_ref_f32(z, params)
    assert jnp.allclose(out, ref32, atol=2e-2, rtol=2e-2)
    # rows sum to 1 (softmax)
    assert jnp.allclose(jnp.sum(out, axis=-1), jnp.ones((B,)), atol=1e-4)

    print("KERNEL_OK")
</pallas_src>

<mosaic_0001>
module attributes {stable_mosaic.version = 11 : i64} {
  func.func @decoder_y_kernel(%arg0: i32, %arg1: memref<16x32xf32, #tpu.memory_space<vmem>>, %arg2: memref<32x64xbf16, #tpu.memory_space<vmem>>, %arg3: memref<1x64xf32, #tpu.memory_space<vmem>>, %arg4: memref<64x64xbf16, #tpu.memory_space<vmem>>, %arg5: memref<1x64xf32, #tpu.memory_space<vmem>>, %arg6: memref<64x128xbf16, #tpu.memory_space<vmem>>, %arg7: memref<1x128xf32, #tpu.memory_space<vmem>>, %arg8: memref<8x16xf32, #tpu.memory_space<vmem>>) attributes {dimension_semantics = [#tpu.dimension_semantics<parallel>], iteration_bounds = array<i64: 1>, scalar_prefetch = 0 : i64, scratch_operands = 0 : i64, tpu.core_type = #tpu.core_type<tc>, window_params = [{transform_indices = @transform_0, window_bounds = array<i64: 16, 32>}, {pipeline_mode = #tpu.pipeline_mode<synchronous>, transform_indices = @transform_1, window_bounds = array<i64: 32, 64>}, {pipeline_mode = #tpu.pipeline_mode<synchronous>, transform_indices = @transform_2, window_bounds = array<i64: 1, 64>}, {pipeline_mode = #tpu.pipeline_mode<synchronous>, transform_indices = @transform_3, window_bounds = array<i64: 64, 64>}, {pipeline_mode = #tpu.pipeline_mode<synchronous>, transform_indices = @transform_4, window_bounds = array<i64: 1, 64>}, {pipeline_mode = #tpu.pipeline_mode<synchronous>, transform_indices = @transform_5, window_bounds = array<i64: 64, 128>}, {pipeline_mode = #tpu.pipeline_mode<synchronous>, transform_indices = @transform_6, window_bounds = array<i64: 1, 128>}, {transform_indices = @transform_7, window_bounds = array<i64: 8, 16>}]} {
    %c0 = arith.constant 0 : index
    %c0_0 = arith.constant 0 : index
    %0 = vector.load %arg1[%c0, %c0_0] : memref<16x32xf32, #tpu.memory_space<vmem>>, vector<16x32xf32>
    %1 = arith.truncf %0 : vector<16x32xf32> to vector<16x32xbf16>
    %c0_1 = arith.constant 0 : index
    %c0_2 = arith.constant 0 : index
    %2 = vector.load %arg2[%c0_1, %c0_2] : memref<32x64xbf16, #tpu.memory_space<vmem>>, vector<32x64xbf16>
    %cst = arith.constant dense<0.000000e+00> : vector<16x64xf32>
    %3 = tpu.matmul %1, %2, %cst {dimension_numbers = #tpu.dot_dimension_numbers<[1], [0], [0], [1], [0, 0, 1, 1], [], []>} : vector<16x32xbf16>, vector<32x64xbf16>, vector<16x64xf32> -> vector<16x64xf32>
    %c0_3 = arith.constant 0 : index
    %c0_4 = arith.constant 0 : index
    %4 = vector.load %arg3[%c0_3, %c0_4] : memref<1x64xf32, #tpu.memory_space<vmem>>, vector<1x64xf32>
    %5 = vector.broadcast %4 : vector<1x64xf32> to vector<16x64xf32>
    %6 = arith.addf %3, %5 : vector<16x64xf32>
    %cst_5 = arith.constant 0.000000e+00 : f32
    %7 = vector.broadcast %cst_5 : f32 to vector<16x64xf32>
    %8 = arith.maximumf %6, %7 : vector<16x64xf32>
    %9 = arith.truncf %8 : vector<16x64xf32> to vector<16x64xbf16>
    %c0_6 = arith.constant 0 : index
    %c0_7 = arith.constant 0 : index
    %10 = vector.load %arg4[%c0_6, %c0_7] : memref<64x64xbf16, #tpu.memory_space<vmem>>, vector<64x64xbf16>
    %cst_8 = arith.constant dense<0.000000e+00> : vector<16x64xf32>
    %11 = tpu.matmul %9, %10, %cst_8 {dimension_numbers = #tpu.dot_dimension_numbers<[1], [0], [0], [1], [0, 0, 1, 1], [], []>} : vector<16x64xbf16>, vector<64x64xbf16>, vector<16x64xf32> -> vector<16x64xf32>
    %c0_9 = arith.constant 0 : index
    %c0_10 = arith.constant 0 : index
    %12 = vector.load %arg5[%c0_9, %c0_10] : memref<1x64xf32, #tpu.memory_space<vmem>>, vector<1x64xf32>
    %13 = vector.broadcast %12 : vector<1x64xf32> to vector<16x64xf32>
    %14 = arith.addf %11, %13 : vector<16x64xf32>
    %cst_11 = arith.constant 0.000000e+00 : f32
    %15 = vector.broadcast %cst_11 : f32 to vector<16x64xf32>
    %16 = arith.maximumf %14, %15 : vector<16x64xf32>
    %17 = arith.truncf %16 : vector<16x64xf32> to vector<16x64xbf16>
    %c0_12 = arith.constant 0 : index
    %c0_13 = arith.constant 0 : index
    %18 = vector.load %arg6[%c0_12, %c0_13] : memref<64x128xbf16, #tpu.memory_space<vmem>>, vector<64x128xbf16>
    %cst_14 = arith.constant dense<0.000000e+00> : vector<16x128xf32>
    %19 = tpu.matmul %17, %18, %cst_14 {dimension_numbers = #tpu.dot_dimension_numbers<[1], [0], [0], [1], [0, 0, 1, 1], [], []>} : vector<16x64xbf16>, vector<64x128xbf16>, vector<16x128xf32> -> vector<16x128xf32>
    %c0_15 = arith.constant 0 : index
    %c0_16 = arith.constant 0 : index
    %20 = vector.load %arg7[%c0_15, %c0_16] : memref<1x128xf32, #tpu.memory_space<vmem>>, vector<1x128xf32>
    %21 = vector.broadcast %20 : vector<1x128xf32> to vector<16x128xf32>
    %22 = arith.addf %19, %21 : vector<16x128xf32>
    %cst_17 = arith.constant dense<0xFF800000> : vector<16xf32>
    %23 = vector.multi_reduction <maximumf>, %22, %cst_17 [1] : vector<16x128xf32> to vector<16xf32>
    %24 = vector.shape_cast %23 : vector<16xf32> to vector<16x1xf32>
    %25 = vector.broadcast %24 : vector<16x1xf32> to vector<16x128xf32>
    %26 = arith.subf %22, %25 : vector<16x128xf32>
    %27 = math.exp %26 : vector<16x128xf32>
    %cst_18 = arith.constant dense<0.000000e+00> : vector<16xf32>
    %28 = vector.multi_reduction <add>, %27, %cst_18 [1] : vector<16x128xf32> to vector<16xf32>
    %29 = vector.shape_cast %28 : vector<16xf32> to vector<16x1xf32>
    %30 = tpu.reciprocal %29 {approx = true} : vector<16x1xf32> -> vector<16x1xf32>
    %31 = arith.mulf %29, %30 : vector<16x1xf32>
    %cst_19 = arith.constant 2.000000e+00 : f32
    %32 = vector.broadcast %cst_19 : f32 to vector<16x1xf32>
    %33 = arith.subf %32, %31 : vector<16x1xf32>
    %34 = arith.mulf %30, %33 : vector<16x1xf32>
    %35 = vector.broadcast %34 : vector<16x1xf32> to vector<16x128xf32>
    %36 = arith.mulf %27, %35 : vector<16x128xf32>
    %37 = tpu.transpose %36, [1, 0] : vector<16x128xf32> -> vector<128x16xf32>
    %38 = vector.extract_strided_slice %37 {offsets = [0, 0], sizes = [8, 16], strides = [1, 1]} : vector<128x16xf32> to vector<8x16xf32>
    %c0_20 = arith.constant 0 : index
    %c0_21 = arith.constant 0 : index
    %39 = vector.load %arg8[%c0_20, %c0_21] : memref<8x16xf32, #tpu.memory_space<vmem>>, vector<8x16xf32>
    tpu.vector_store %arg8[%c0_20, %c0_21], %38 {strides = array<i32>} : memref<8x16xf32, #tpu.memory_space<vmem>>, vector<8x16xf32>,
    return
  }
  func.func @transform_0(%arg0: i32) -> (i32, i32) {
    %c0_i32 = arith.constant 0 : i32
    %c0_i32_0 = arith.constant 0 : i32
    return %arg0, %c0_i32 : i32, i32
  }
  func.func @transform_1(%arg0: i32) -> (i32, i32) {
    %c0_i32 = arith.constant 0 : i32
    %c0_i32_0 = arith.constant 0 : i32
    %c0_i32_1 = arith.constant 0 : i32
    return %c0_i32, %c0_i32_0 : i32, i32
  }
  func.func @transform_2(%arg0: i32) -> (i32, i32) {
    %c0_i32 = arith.constant 0 : i32
    %c0_i32_0 = arith.constant 0 : i32
    %c0_i32_1 = arith.constant 0 : i32
    return %c0_i32, %c0_i32_0 : i32, i32
  }
  func.func @transform_3(%arg0: i32) -> (i32, i32) {
    %c0_i32 = arith.constant 0 : i32
    %c0_i32_0 = arith.constant 0 : i32
    %c0_i32_1 = arith.constant 0 : i32
    return %c0_i32, %c0_i32_0 : i32, i32
  }
  func.func @transform_4(%arg0: i32) -> (i32, i32) {
    %c0_i32 = arith.constant 0 : i32
    %c0_i32_0 = arith.constant 0 : i32
    %c0_i32_1 = arith.constant 0 : i32
    return %c0_i32, %c0_i32_0 : i32, i32
  }
  func.func @transform_5(%arg0: i32) -> (i32, i32) {
    %c0_i32 = arith.constant 0 : i32
    %c0_i32_0 = arith.constant 0 : i32
    %c0_i32_1 = arith.constant 0 : i32
    return %c0_i32, %c0_i32_0 : i32, i32
  }
  func.func @transform_6(%arg0: i32) -> (i32, i32) {
    %c0_i32 = arith.constant 0 : i32
    %c0_i32_0 = arith.constant 0 : i32
    %c0_i32_1 = arith.constant 0 : i32
    return %c0_i32, %c0_i32_0 : i32, i32
  }
  func.func @transform_7(%arg0: i32) -> (i32, i32) {
    %c0_i32 = arith.constant 0 : i32
    %c0_i32_0 = arith.constant 0 : i32
    return %c0_i32, %arg0 : i32, i32
  }
}

</mosaic_0001>

<bundles_post_ra>
// kernel: decoder_y.1
= control target key start
LH: loop header
LB: loop body
LE: loop exit
PB: predicated region body
PF: predicated region fallthrough
CT: control target
= control target key end

     0   :  { %12 = vsyncpa [#allocation3], 0  ;;  %s601_s0 = inlined_call_operand.vmem [shape: f32[16,32], index: 0, kind: input, shape index: {}]   ;;  %s602_s1 = inlined_call_operand.hbm [shape: bf16[32,64], index: 1, kind: input, shape index: {}]   ;;  %s603_s2 = inlined_call_operand.vmem [shape: f32[1,64], index: 2, kind: input, shape index: {}]   ;;  %s604_s3 = inlined_call_operand.vmem [shape: bf16[64,64], index: 3, kind: input, shape index: {}]   ;;  %s605_s4 = inlined_call_operand.vmem [shape: f32[1,64], index: 4, kind: input, shape index: {}]   ;;  %s606_s5 = inlined_call_operand.hbm [shape: bf16[64,128], index: 5, kind: input, shape index: {}]   ;;  %s607_s6 = inlined_call_operand.vmem [shape: f32[1,128], index: 6, kind: input, shape index: {}]   ;;  %s608_s7 = inlined_call_operand.vmem [shape: f32[8,16], index: 7, kind: output, shape index: {}]  }
   0x1   :  { %13 = vsyncpa [#allocation5], 0  ;;  %s496_s24 = smov [#allocation2]   ;;  %s448_s28 = scalar_lea.hbm %s602_s1, 256 }
   0x2   :  { %s21_s25 = sshll.u32 %s496_s24, 4  ;;  %p449_p0 = scmp.ne.s32.totalorder %s602_s1, %s448_s28  ;;  %s22_s25 = int_to_ptr.vmem [resolvable:$true] %s21_s25 }
   0x3   :  { %p452_p1 = scmp.lt.u32.totalorder %s448_s28, %s602_s1 }
   0x5   :  { %p454_p2 = pnand %p452_p1, %p449_p0 }
   0x7   :  { %457 = shalt.err (!%p454_p2)
}
   0x8   :  { %s458_s10 = scalar_lea.vmem %s22_s25, 256  ;;  %p463_p4 = scmp.lt.s32.totalorder %s22_s25, %s22_s25 }
   0x9   :  { %p459_p3 = scmp.ne.s32.totalorder %s22_s25, %s458_s10  ;;  %p464_p5 = scmp.lt.s32.totalorder %s458_s10, %s458_s10 }
   0xb   :  { %p465_p6 = por %p464_p5, %p463_p4 }
   0xd   :  { %p466_p7 = pnand %p465_p6, %p459_p3 }
   0xf   :  { %469 = shalt.err (!%p466_p7)
}
  0x10   :  { %s497_s11 = smov 64   ;;  %s498_s12 = smov 4  }
  0x11   :  { %27 = dma.hbm_to_vmem [thread:$0]  %s602_s1, 256, %s22_s25, [#allocation3], %s497_s11, %s497_s11, %s498_s12  }
  0x12   :  { %s499_s15 = smov [#allocation4]   ;;  %s470_s19 = scalar_lea.hbm %s606_s5, 512 }
  0x13   :  { %s39_s16 = sshll.u32 %s499_s15, 4  ;;  %p471_p8 = scmp.ne.s32.totalorder %s606_s5, %s470_s19  ;;  %s40_s16 = int_to_ptr.vmem [resolvable:$true] %s39_s16 }
  0x14   :  { %p474_p9 = scmp.lt.u32.totalorder %s470_s19, %s606_s5 }
  0x16   :  { %p476_p10 = pnand %p474_p9, %p471_p8 }
  0x18   :  { %479 = shalt.err (!%p476_p10)
}
  0x19   :  { %s480_s24 = scalar_lea.vmem %s40_s16, 512  ;;  %p485_p12 = scmp.lt.s32.totalorder %s40_s16, %s40_s16 }
  0x1a   :  { %p481_p11 = scmp.ne.s32.totalorder %s40_s16, %s480_s24  ;;  %p486_p13 = scmp.lt.s32.totalorder %s480_s24, %s480_s24 }
  0x1c   :  { %p487_p0 = por %p486_p13, %p485_p12 }
  0x1e   :  { %p488_p1 = pnand %p487_p0, %p481_p11 }
  0x20   :  { %491 = shalt.err (!%p488_p1)
}
  0x21   :  { %45 = dma.hbm_to_vmem [thread:$0]  %s606_s5, 512, %s40_s16, [#allocation5], %s497_s11, %s497_s11, %s498_s12  }
  0x22   :  { %492 = dma.done.wait [#allocation3], 256  }
  0x23   :  { %493 = vsyncadd [#allocation3], 4294967040 }
  0x24   :  { %494 = dma.done.wait [#allocation5], 512  }
  0x25   :  { %495 = vsyncadd [#allocation5], 4294966784  ;;  %v500_v0 = vmov 0.0   ;;  %vm501_vm0 = vmmov 0   ;;  %v430_v1 = vld [vmem:[#allocation2] sm:$0xff]   ;;  %v431_v2 = vld [vmem:[#allocation2 + $0x8] sm:$0xff]  }
  0x26   :  { %392 = vmatprep.subr.bf16.mxu0 %v500_v0  ;;  %396 = vmatprep.mubr.msk.bf16.mxu0 %vm501_vm0, %v500_v0  ;;  %v55_v3 = vld [vmem:[%s601_s0] sm:$0xff]  ;;  %v56_v4 = vld [vmem:[%s601_s0 + $0x8] sm:$0xff]  ;;  %vm81_vm1 = vcmask 261120   ;;  %v434_v8 = vld [vmem:[%s604_s3 + $0x10] sm:$0xff]   ;;  %vm168_vm2 = vcmask 523264   ;;  %vm355_vm3 = vcmask 130048  }
  0x27   :  { %400 = vmatprep.subr.bf16.mxu1 %v500_v0  ;;  %408 = vmatprep.mubr.msk.bf16.mxu1 %vm501_vm0, %v500_v0  ;;  %v432_v5 = vld [vmem:[%s604_s3] sm:$0xff]   ;;  %v433_v6 = vld [vmem:[%s604_s3 + $0x8] sm:$0xff]   ;;  %v57_v7 = vpack.c.bf16 %v56_v4, %v55_v3  ;;  %v435_v9 = vld [vmem:[%s604_s3 + $0x18] sm:$0xff]  }
  0x28   :  { %393 = vmatpush3.bf16.msra.mxu0 %v430_v1  ;;  %401 = vmatpush3.bf16.msra.mxu1 %v432_v5  ;;  %v436_v10 = vld [vmem:[#allocation4] sm:$0xff]   ;;  %v437_v11 = vld [vmem:[#allocation4 + $0x8] sm:$0xff]   ;;  %v363_v12 = vld [vmem:[%s603_s2] ss:$0 sm:$0xff] }
  0x29   :  { %394 = vmatprep.subr.bf16.mxu0 %v500_v0  ;;  %402 = vmatprep.subr.bf16.mxu1 %v500_v0  ;;  %v438_v22 = vld [vmem:[#allocation4 + $0x10] sm:$0xff]   ;;  %v439_v23 = vld [vmem:[#allocation4 + $0x18] sm:$0xff]  }
  0x2a   :  { %v367_v24 = vld [vmem:[%s605_s4] ss:$0 sm:$0xff] }
  0x2b   :  { %v373_v34 = vld [vmem:[%s607_s6] ss:$0 sm:$0xff] }
  0x2c   :  { %395 = vmatpush3.bf16.msra.mxu0 %v431_v2  ;;  %403 = vmatpush3.bf16.msra.mxu1 %v433_v6 }
  0x2d   :  { %412 = vmatprep.subr.bf16.mxu0 %v500_v0  ;;  %404 = vmatprep.subr.bf16.mxu1 %v500_v0 }
  0x2f   :  { %397 = vmatmul.mubr.msk.bf16.vlgmr.msra.gmra.mrb[0].mxu0 %vm81_vm1, %v57_v7 }
  0x30   :  { %420 = vmatprep.mubr.msk.bf16.mxu0 %vm501_vm0, %v500_v0  ;;  %405 = vmatpush3.bf16.msra.mxu1 %v434_v8 }
  0x31   :  { %406 = vmatprep.subr.bf16.mxu1 %v500_v0  ;;  %413 = vmatpush3.bf16.msra.mxu0 %v436_v10 }
  0x32   :  { %414 = vmatprep.subr.bf16.mxu0 %v500_v0 }
  0x34   :  { %407 = vmatpush3.bf16.msra.mxu1 %v435_v9 }
  0x35   :  { %415 = vmatpush3.bf16.msra.mxu0 %v437_v11 }
  0x36   :  { %416 = vmatprep.subr.bf16.mxu0 %v500_v0 }
  0x39   :  { %417 = vmatpush3.bf16.msra.mxu0 %v438_v22 }
  0x3a   :  { %418 = vmatprep.subr.bf16.mxu0 %v500_v0 }
  0x3d   :  { %419 = vmatpush3.bf16.msra.mxu0 %v439_v23 }
 0x102   :  { %v119_v13 = vpop.f32.mrb[0].mxu0 }
 0x103   :  { %v120_v14 = vadd.f32 %v363_v12, %v119_v13  ;;  %v398_v15 = vpop.f32.mrb[1].mxu0 }
 0x104   :  { %v122_v16 = vpop.f32.mrb[2].mxu0 }
 0x105   :  { %v123_v17 = vadd.f32 %v363_v12, %v122_v16  ;;  %v399_v18 = vpop.f32.mrb[3].mxu0  ;;  %v126_v19 = vmax.f32 %v120_v14, 0.0 }
 0x107   :  { %v127_v20 = vmax.f32 %v123_v17, 0.0 }
 0x109   :  { %v128_v21 = vpack.c.bf16 %v127_v20, %v126_v19 }
 0x10b   :  { %409 = vmatmul.mubr.msk.bf16.vlgmr.msra.gmra.mrb[0].mxu1 %vm168_vm2, %v128_v21 }
 0x1de   :  { %v206_v25 = vpop.f32.mrb[0].mxu1 }
 0x1df   :  { %v207_v26 = vadd.f32 %v367_v24, %v206_v25  ;;  %v410_v27 = vpop.f32.mrb[1].mxu1 }
 0x1e0   :  { %v209_v28 = vpop.f32.mrb[2].mxu1 }
 0x1e1   :  { %v210_v29 = vadd.f32 %v367_v24, %v209_v28  ;;  %v411_v30 = vpop.f32.mrb[3].mxu1  ;;  %v213_v31 = vmax.f32 %v207_v26, 0.0 }
 0x1e3   :  { %v214_v32 = vmax.f32 %v210_v29, 0.0 }
 0x1e5   :  { %v215_v33 = vpack.c.bf16 %v214_v32, %v213_v31 }
 0x1e7   :  { %421 = vmatmul.mubr.msk.bf16.vlgmr.msra.gmra.mrb[4].mxu0 %vm168_vm2, %v215_v33 }
 0x2ba   :  { %v292_v35 = vpop.f32.mrb[4].mxu0 }
 0x2bb   :  { %v293_v36 = vadd.f32 %v373_v34, %v292_v35  ;;  %v422_v37 = vpop.f32.mrb[5].mxu0 }
 0x2bc   :  { %v295_v38 = vpop.f32.mrb[6].mxu0 }
 0x2bd   :  { %299 = vmax.xlane.f32.xlu0 %v293_v36  ;;  %v423_v39 = vpop.f32.mrb[7].mxu0  ;;  %v296_v40 = vadd.f32 %v373_v34, %v295_v38 }
 0x2c1   :  { %301 = vmax.xlane.f32.xlu0 %v296_v40 }
 0x34a   :  { %v300_v41 = vpop.xlane.xlu0 %299 }
 0x34b   :  { %v303_v42 = vsub.f32 %v293_v36, %v300_v41 }
 0x34d   :  { %v305_v43 = vmul.f32 1.442695, %v303_v42 }
 0x34e   :  { %v302_v44 = vpop.xlane.xlu0 %301 }
 0x34f   :  { %440 = vpow2.f32 %v305_v43  ;;  %v304_v45 = vsub.f32 %v296_v40, %v302_v44 }
 0x351   :  { %v307_v46 = vmul.f32 1.442695, %v304_v45 }
 0x353   :  { %442 = vpow2.f32 %v307_v46 }
 0x359   :  { %v441_v47 = vpop.eup %440 }
 0x35a   :  { %309 = vadd.xlane.f32.xlu1 %v441_v47 }
 0x35d   :  { %v443_v48 = vpop.eup %442 }
 0x35e   :  { %311 = vadd.xlane.f32.xlu1 %v443_v48 }
 0x3e7   :  { %v310_v49 = vpop.xlane.xlu1 %309 }
 0x3e8   :  { %444 = vrcp.f32 %v310_v49 }
 0x3eb   :  { %v312_v50 = vpop.xlane.xlu1 %311 }
 0x3ec   :  { %446 = vrcp.f32 %v312_v50 }
 0x3f2   :  { %v445_v51 = vpop.eup %444 }
 0x3f3   :  { %v315_v52 = vmul.f32 %v445_v51, %v310_v49 }
 0x3f5   :  { %v317_v53 = vsub.f32 2.0, %v315_v52 }
 0x3f6   :  { %v447_v54 = vpop.eup %446 }
 0x3f7   :  { %v316_v55 = vmul.f32 %v447_v54, %v312_v50  ;;  %v319_v56 = vmul.f32 %v445_v51, %v317_v53 }
 0x3f9   :  { %v318_v57 = vsub.f32 2.0, %v316_v55  ;;  %v321_v58 = vmul.f32 %v441_v47, %v319_v56 }
 0x3fb   :  { %v320_v59 = vmul.f32 %v447_v54, %v318_v57  ;;  %323 = vxpose.xlu0.b32.start [1/2] (short) (narrow) %v321_v58, 8 }
 0x3fd   :  { %v322_v60 = vmul.f32 %v443_v48, %v320_v59 }
 0x3ff   :  { %324 = vxpose.xlu0.b32.end [2/2] (short) (narrow) %v322_v60, 8 }
 0x47b   :  { %v339_v61 = vpop.trf.xlu0 }
 0x47c   :  { %356 = vst.msk [vmem:[%s608_s7] sm:$0xff] %vm355_vm3, %v339_v61 }
 0x47d   :  { %361 = vsyncpa [#allocation3], 1 }
 0x47e   :  { %362 = vsyncpa [#allocation5], 1 }

</bundles_post_ra>
